<compile_context>
chip_gen: v6e
topology: v6e:2x2x1
jax: 0.10.0
libtpu: 0.0.40
codegen_flags: <defaults>
</compile_context>

<pallas_src>
import functools
import math

import jax
import jax.numpy as jnp
import numpy as np
from jax.experimental import pallas as pl
from jax.experimental.pallas import tpu as pltpu


def _so3_dim(lmax: int) -> int:
    return sum((2 * l + 1) ** 2 for l in range(lmax + 1))


def _round_up(x: int, m: int) -> int:
    return ((x + m - 1) // m) * m


@functools.lru_cache(maxsize=None)
def _s2_to_so3_selector(lmax: int) -> np.ndarray:
    """Static 0/1 scatter tensor, built once per lmax on the host.

    sel[a, i, j] = 1  iff  a = l^2 + m1, i = l^2 + m2, j = off_l + m1*(2l+1) + m2.
    Lets the full block-structured linear map be a single einsum (no per-l scatter loop).
    """
    s2 = (lmax + 1) ** 2
    so3 = _so3_dim(lmax)
    sel = np.zeros((s2, s2, so3), np.float32)
    off = 0
    for l in range(lmax + 1):
        d = 2 * l + 1
        ls = l * l
        for m1 in range(d):
            for m2 in range(d):
                sel[ls + m1, ls + m2, off + m1 * d + m2] = 1.0
        off += d * d
    return sel


def _s2conv_kernel(x_ref, w_ref, o_ref):
    """One (batch-tile, N-tile) grid step: a single canonical MXU matmul.

    x_ref: (TB, K_PAD)    flattened input rows for this batch tile (resident across N)
    w_ref: (K_PAD, TN)    block-structured linear map tile (streamed over N)
    o_ref: (TB, TN)       lane-dense (128/256-multiple) output tile
    """
    # HIGHEST only matters for f32 operands (multi-pass f32 MXU); bf16 is native.
    prec = jax.lax.Precision.HIGHEST if x_ref.dtype == jnp.float32 else None
    acc = jnp.dot(x_ref[...], w_ref[...],
                  preferred_element_type=jnp.float32, precision=prec)
    o_ref[...] = acc.astype(o_ref.dtype)


def _build_linear_matrix(w, Y, lmax, k_pad, out_pad, operand_dtype):
    """Batch-independent weight preprocessing (hoisted out of the kernel, jit-fusable).

    Returns W2d (k_pad x out_pad) with
      W2d[f*S2 + i, g*SO3 + off_l + m1*d + m2]
        = psi[f, g, l^2+m1] / sqrt(f_in)   if i == l^2 + m2, else 0.
    """
    f_in, f_out, n_grid = w.shape
    s2 = (lmax + 1) ** 2
    so3 = _so3_dim(lmax)
    hi = jax.lax.Precision.HIGHEST

    psi = jnp.einsum("ni,fgn->fgi", Y.astype(jnp.float32), w.astype(jnp.float32),
                     precision=hi) * (1.0 / (math.sqrt(n_grid) * math.sqrt(f_in)))
    sel = jnp.asarray(_s2_to_so3_selector(lmax))             # (s2, s2, so3) constant
    wmat = jnp.einsum("fga,aij->figj", psi, sel, precision=hi)
    wmat = wmat.reshape(f_in * s2, f_out * so3)
    wmat = jnp.pad(wmat, ((0, k_pad - f_in * s2), (0, out_pad - f_out * so3)))
    # TODO(synk): for large lmax/f_out switch to per-l block matmuls (psi streamed per
    # l) instead of this dense form — density is 1/(lmax+1)^2 and W grows quadratically.
    return wmat.astype(operand_dtype)


def s2_convolution(x, w, Y, lmax, *, operand_dtype=jnp.bfloat16,
                   out_dtype=jnp.float32):
    """Pallas forward. x:(B,f_in,(lmax+1)^2)  w:(f_in,f_out,N)  Y:(N,(lmax+1)^2)."""
    B, f_in, s2_dim = x.shape
    f_in_w, f_out, n_grid = w.shape
    assert f_in == f_in_w and s2_dim == (lmax + 1) ** 2
    assert Y.shape == (n_grid, s2_dim)
    so3 = _so3_dim(lmax)
    out_cols = f_out * so3

    operand_bytes = jnp.dtype(operand_dtype).itemsize
    out_bytes = jnp.dtype(out_dtype).itemsize

    # K: pad to a multiple of 128 -> lane-dense x loads, sublane-aligned W rows.
    k = f_in * s2_dim
    k_pad = _round_up(k, 128)

    # N tiling: lane-dense output stores; when tiled, use 512 (multiple of 256 so every
    # MXU pass is full width on v6e/v7x) and stream W tiles from HBM.
    out_pad = _round_up(out_cols, 128)
    if out_pad > 512:
        tn = 512
        out_pad = _round_up(out_cols, tn)
    else:
        tn = out_pad
    n_tiles = out_pad // tn

    # Batch tiling: big tiles amortise ~0.35us/step; multiples of 16 (bf16 sublane
    # packing, also fine for f32); >=2 tiles when possible so both v7x TCs get work.
    if B <= 16:
        tb = B
    else:
        tb = min(256, _round_up((B + 1) // 2, 16))
    b_pad = _round_up(B, tb)

    # W buffering: a *large* fully-resident W (single N tile, constant index_map) is
    # never re-DMAed, so its second pipeline buffer is pure VMEM waste -> Buffered(1).
    # Small resident W keeps the (known-good) default double-buffered spec.
    w_tile_bytes = k_pad * tn * operand_bytes
    w_bufs = 1 if (n_tiles == 1 and w_tile_bytes > (4 << 20)) else 2

    # Explicit VMEM budget: 2x x-tile + W buffers + 2x out-tile, with headroom; shrink
    # the batch tile if we would exceed ~56 MiB (stay under v7x's 64 MiB physical VMEM).
    def _budget(tb_):
        return (2 * tb_ * k_pad * operand_bytes + w_bufs * w_tile_bytes
                + 2 * tb_ * tn * out_bytes)

    VMEM_CAP = 56 << 20
    while _budget(tb) > VMEM_CAP and tb > 16:
        tb = max(16, _round_up(tb // 2, 16))
        b_pad = _round_up(B, tb)
    vmem_limit = min(max(int(_budget(tb) * 1.4) + (2 << 20), 32 << 20), VMEM_CAP)

    # Batch-independent: psi + the entire s2->so3 linear map, built once (jit-fused).
    wmat = _build_linear_matrix(w, Y, lmax, k_pad, out_pad, operand_dtype)

    x2d = x.reshape(B, k).astype(operand_dtype)
    x2d = jnp.pad(x2d, ((0, b_pad - B), (0, k_pad - k)))

    w_spec_kwargs = {}
    if w_bufs == 1:
        w_spec_kwargs["pipeline_mode"] = pl.Buffered(1)

    flops = 2 * b_pad * k_pad * out_pad
    bytes_accessed = (b_pad * k_pad * operand_bytes
                      + k_pad * out_pad * operand_bytes
                      + b_pad * out_pad * out_bytes)

    out = pl.pallas_call(
        _s2conv_kernel,
        out_shape=jax.ShapeDtypeStruct((b_pad, out_pad), out_dtype),
        grid=(b_pad // tb, n_tiles),
        in_specs=[
            pl.BlockSpec((tb, k_pad), lambda i, j: (i, 0)),          # x batch tile
            pl.BlockSpec((k_pad, tn), lambda i, j: (0, j),           # W (streamed in N)
                         **w_spec_kwargs),
        ],
        out_specs=pl.BlockSpec((tb, tn), lambda i, j: (i, j)),
        compiler_params=pltpu.CompilerParams(
            dimension_semantics=("parallel", "parallel"),
            vmem_limit_bytes=vmem_limit),
        cost_estimate=pl.CostEstimate(flops=flops, transcendentals=0,
                                      bytes_accessed=bytes_accessed),
    )(x2d, wmat)

    return out[:B, :out_cols].reshape(B, f_out, so3)


def s2_convolution_ref(x, w, Y, lmax):
    """Pure-JAX reference of the PyTorch forward, at HIGHEST precision."""
    B, f_in, _ = x.shape
    f_out = w.shape[1]
    n = Y.shape[0]
    hi = jax.lax.Precision.HIGHEST
    psi = jnp.einsum("ni,fgn->fgi", Y, w, precision=hi) / math.sqrt(n)
    outs = []
    for l in range(lmax + 1):
        d = 2 * l + 1
        sl = slice(l * l, l * l + d)
        o = jnp.einsum("fgm,bfn->bgmn", psi[:, :, sl], x[:, :, sl],
                       precision=hi) / math.sqrt(f_in)
        outs.append(o.reshape(B, f_out, d * d))
    return jnp.concatenate(outs, axis=-1)


if __name__ == "__main__":
    LMAX = 3
    B, F_IN, F_OUT = 2, 4, 6
    N_GRID = 10                       # kernel_grid.shape[1]
    S2_DIM = (LMAX + 1) ** 2          # 16

    key = jax.random.PRNGKey(0)
    kx, kw, ky = jax.random.split(key, 3)

    x = jax.random.normal(kx, (B, F_IN, S2_DIM), dtype=jnp.float32)
    # parameter 'w' ~ torch.randn(f_in, f_out, kernel_grid.shape[1]), deterministic here
    w = jax.random.normal(kw, (F_IN, F_OUT, N_GRID), dtype=jnp.float32)
    # TODO(synk): Y should be o3.spherical_harmonics_alpha_beta(range(lmax+1), *kernel_grid,
    # normalization='component'); it is an init-time buffer, so a deterministic random
    # stand-in of the exact same shape (N_GRID, (LMAX+1)**2) is used here.
    Y = jax.random.normal(ky, (N_GRID, S2_DIM), dtype=jnp.float32)

    ref = jax.block_until_ready(s2_convolution_ref(x, w, Y, LMAX))

    # All-f32 operand path: HIGHEST-precision in-kernel MXU vs HIGHEST-precision
    # reference -> tight tolerance so indexing/weight-construction bugs cannot hide.
    fwd_f32 = jax.jit(functools.partial(s2_convolution, lmax=LMAX,
                                        operand_dtype=jnp.float32))
    out_f32 = jax.block_until_ready(fwd_f32(x, w, Y))
    assert out_f32.shape == ref.shape == (B, F_OUT, _so3_dim(LMAX))
    err32 = float(jnp.max(jnp.abs(out_f32 - ref)))
    if not bool(jnp.allclose(out_f32, ref, atol=2e-5, rtol=2e-5)):
        raise AssertionError(f"f32 kernel/reference mismatch, max abs err = {err32}")

    # Default fast path: bf16 operands, f32 MXU accumulation. Looser, dtype-appropriate
    # bound (error grows with K = f_in*S2 from bf16 operand rounding).
    fwd_bf16 = jax.jit(functools.partial(s2_convolution, lmax=LMAX))
    out_bf16 = jax.block_until_ready(fwd_bf16(x, w, Y))
    err16 = float(jnp.max(jnp.abs(out_bf16 - ref)))
    if not bool(jnp.allclose(out_bf16, ref, atol=5e-2, rtol=5e-2)):
        raise AssertionError(f"bf16 kernel/reference mismatch, max abs err = {err16}")

    print("KERNEL_OK")
</pallas_src>

<mosaic_0001>
module attributes {stable_mosaic.version = 11 : i64} {
  func.func @_s2conv_kernel(%arg0: i32, %arg1: i32, %arg2: memref<2x128xf32, #tpu.memory_space<vmem>>, %arg3: memref<128x512xf32, #tpu.memory_space<vmem>>, %arg4: memref<2x512xf32, #tpu.memory_space<vmem>>) attributes {dimension_semantics = [#tpu.dimension_semantics<parallel>, #tpu.dimension_semantics<parallel>], iteration_bounds = array<i64: 1, 1>, scalar_prefetch = 0 : i64, scratch_operands = 0 : i64, tpu.core_type = #tpu.core_type<tc>, window_params = [{transform_indices = @transform_0, window_bounds = array<i64: 2, 128>}, {transform_indices = @transform_1, window_bounds = array<i64: 128, 512>}, {transform_indices = @transform_2, window_bounds = array<i64: 2, 512>}]} {
    %c0 = arith.constant 0 : index
    %c0_0 = arith.constant 0 : index
    %0 = vector.load %arg2[%c0, %c0_0] : memref<2x128xf32, #tpu.memory_space<vmem>>, vector<2x128xf32>
    %c0_1 = arith.constant 0 : index
    %c0_2 = arith.constant 0 : index
    %1 = vector.load %arg3[%c0_1, %c0_2] : memref<128x512xf32, #tpu.memory_space<vmem>>, vector<128x512xf32>
    %cst = arith.constant dense<0.000000e+00> : vector<2x512xf32>
    %2 = tpu.matmul %0, %1, %cst {dimension_numbers = #tpu.dot_dimension_numbers<[1], [0], [0], [1], [0, 0, 1, 1], [], []>, precision = #tpu.contract_precision<fp32>} : vector<2x128xf32>, vector<128x512xf32>, vector<2x512xf32> -> vector<2x512xf32>
    %c0_3 = arith.constant 0 : index
    %c0_4 = arith.constant 0 : index
    %3 = vector.load %arg4[%c0_3, %c0_4] : memref<2x512xf32, #tpu.memory_space<vmem>>, vector<2x512xf32>
    tpu.vector_store %arg4[%c0_3, %c0_4], %2 {strides = array<i32>} : memref<2x512xf32, #tpu.memory_space<vmem>>, vector<2x512xf32>,
    return
  }
  func.func @transform_0(%arg0: i32, %arg1: i32) -> (i32, i32) {
    %c0_i32 = arith.constant 0 : i32
    %c0_i32_0 = arith.constant 0 : i32
    return %arg0, %c0_i32 : i32, i32
  }
  func.func @transform_1(%arg0: i32, %arg1: i32) -> (i32, i32) {
    %c0_i32 = arith.constant 0 : i32
    %c0_i32_0 = arith.constant 0 : i32
    return %c0_i32, %arg1 : i32, i32
  }
  func.func @transform_2(%arg0: i32, %arg1: i32) -> (i32, i32) {
    %c0_i32 = arith.constant 0 : i32
    return %arg0, %arg1 : i32, i32
  }
}

</mosaic_0001>

<bundles_post_ra>
// kernel: s2_convolution.1
= control target key start
LH: loop header
LB: loop body
LE: loop exit
PB: predicated region body
PF: predicated region fallthrough
CT: control target
= control target key end

     0   :  { %v3184_v3 = vmov 0.0   ;;  %s3167_s1 = inlined_call_operand.vmem [shape: f32[128,512], index: 1, kind: input, shape index: {}]   ;;  %s3168_s0 = inlined_call_operand.vmem [shape: f32[2,128], index: 0, kind: input, shape index: {}]   ;;  %s3169_s2 = inlined_call_operand.vmem [shape: f32[2,512], index: 2, kind: output, shape index: {}]  }
   0x1   :  { %v73_v0 = vld [vmem:[%s3167_s1 + $0x1e8] sm:$0xff]  ;;  %v72_v1 = vld [vmem:[%s3167_s1 + $0x1e0] sm:$0xff]  ;;  %172 = vmatprep.mubr.f32.mxu0 %v3184_v3  ;;  %408 = vmatprep.mubr.f32.mxu1 %v3184_v3 }
   0x2   :  { %v69_v2 = vld [vmem:[%s3167_s1 + $0x1c8] sm:$0xff]  ;;  %v1843_v4 = vand.u32 4294901760, %v73_v0  ;;  %v1845_v5 = vand.u32 4294901760, %v72_v1  ;;  %v68_v7 = vld [vmem:[%s3167_s1 + $0x1c0] sm:$0xff] }
   0x3   :  { %v1847_v6 = vand.u32 4294901760, %v69_v2  ;;  %v65_v8 = vld [vmem:[%s3167_s1 + $0x1a8] sm:$0xff]  ;;  %v64_v9 = vld [vmem:[%s3167_s1 + $0x1a0] sm:$0xff]  ;;  %v1858_v10 = vand.u32 4294901760, %v68_v7 }
   0x4   :  { %v1860_v11 = vand.u32 4294901760, %v65_v8  ;;  %v1862_v12 = vand.u32 4294901760, %v64_v9  ;;  %v61_v13 = vld [vmem:[%s3167_s1 + $0x188] sm:$0xff]  ;;  %v60_v14 = vld [vmem:[%s3167_s1 + $0x180] sm:$0xff]  ;;  %77 = vmatprep.subr.mxu0 %v1843_v4  ;;  %v1881_v19 = vsub.f32 %v73_v0, %v1843_v4  ;;  %v1903_v24 = vsub.f32 %v72_v1, %v1845_v5 }
   0x5   :  { %v57_v15 = vld [vmem:[%s3167_s1 + $0x168] sm:$0xff]  ;;  %v1874_v16 = vand.u32 4294901760, %v61_v13  ;;  %v1876_v17 = vand.u32 4294901760, %v60_v14  ;;  %v1886_v20 = vld [vmem:[%s3167_s1 + $0x160] sm:$0xff]  ;;  %79 = vmatpush1.msra.mxu0 %v1845_v5  ;;  %v1909_v26 = vsub.f32 %v69_v2, %v1847_v6  ;;  %v1932_v32 = vsub.f32 %v68_v7, %v1858_v10 }
   0x6   :  { %v1878_v18 = vand.u32 4294901760, %v57_v15  ;;  %v1891_v21 = vld [vmem:[%s3167_s1 + $0x148] sm:$0xff]  ;;  %v1896_v22 = vld [vmem:[%s3167_s1 + $0x140] sm:$0xff]  ;;  %v1900_v23 = vand.u32 4294901760, %v1886_v20  ;;  %81 = vmatprep.subr.mxu0 %v1847_v6  ;;  %v3183_v30 = vand.u32 4294901760, %v1881_v19  ;;  %v3181_v34 = vand.u32 4294901760, %v1903_v24 }
   0x7   :  { %v1906_v25 = vand.u32 4294901760, %v1891_v21  ;;  %v1914_v27 = vld [vmem:[%s3167_s1 + $0x128] sm:$0xff]  ;;  %v1919_v28 = vld [vmem:[%s3167_s1 + $0x120] sm:$0xff]  ;;  %v1929_v31 = vand.u32 4294901760, %v1896_v22  ;;  %83 = vmatpush1.msra.mxu0 %v1858_v10  ;;  %v3180_v35 = vand.u32 4294901760, %v1909_v26  ;;  %v1941_v36 = vsub.f32 %v65_v8, %v1860_v11 }
   0x8   :  { %v1924_v29 = vld [vmem:[%s3167_s1 + $0x108] sm:$0xff]  ;;  %v1935_v33 = vand.u32 4294901760, %v1914_v27  ;;  %v1944_v37 = vand.u32 4294901760, %v1919_v28  ;;  %v1949_v38 = vld [vmem:[%s3167_s1 + $0x100] sm:$0xff]  ;;  %85 = vmatprep.subr.mxu0 %v1860_v11  ;;  %v187_v39 = vsub.f32 %v1881_v19, %v3183_v30  ;;  %v3178_v40 = vand.u32 4294901760, %v1932_v32 }
   0x9   :  { %v1957_v41 = vsub.f32 %v64_v9, %v1862_v12  ;;  %v1960_v42 = vand.u32 4294901760, %v1924_v29  ;;  %87 = vmatpush1.msra.mxu0 %v1862_v12  ;;  %v193_v43 = vsub.f32 %v1903_v24, %v3181_v34  ;;  %v199_v44 = vsub.f32 %v1909_v26, %v3180_v35  ;;  %v1976_v47 = vld [vmem:[%s3167_s1 + $0xe8] sm:$0xff]  ;;  %v1989_v52 = vld [vmem:[%s3167_s1 + $0xe0] sm:$0xff] }
   0xa   :  { %3296 = vst [vmem:[#allocation2_spill] sm:$0xff] %v1935_v33  ;;  %3297 = vst [vmem:[#allocation3_spill] sm:$0xff] %v1944_v37  ;;  %v3176_v45 = vand.u32 4294901760, %v1941_v36  ;;  %v1971_v46 = vsub.f32 %v61_v13, %v1874_v16  ;;  %89 = vmatprep.subr.mxu0 %v1874_v16  ;;  %v188_v48 = vand.u32 4294901760, %v187_v39  ;;  %v205_v49 = vsub.f32 %v1932_v32, %v3178_v40  ;;  %v1999_v57 = vld [vmem:[%s3167_s1 + $0xc8] sm:$0xff]  ;;  %v2014_v62 = vld [vmem:[%s3167_s1 + $0xc0] sm:$0xff] }
   0xb   :  { %3298 = vst [vmem:[#allocation4_spill] sm:$0xff] %v1960_v42  ;;  %v3175_v50 = vand.u32 4294901760, %v1957_v41  ;;  %v1984_v51 = vand.u32 4294901760, %v1949_v38  ;;  %91 = vmatpush1.msra.mxu0 %v1876_v17  ;;  %v194_v53 = vand.u32 4294901760, %v193_v43  ;;  %v200_v54 = vand.u32 4294901760, %v199_v44  ;;  %v2029_v7 = vld [vmem:[%s3167_s1 + $0xa8] sm:$0xff] }
   0xc   :  { %v211_v55 = vsub.f32 %v1941_v36, %v3176_v45  ;;  %v3173_v56 = vand.u32 4294901760, %v1971_v46  ;;  %93 = vmatprep.subr.mxu0 %v1878_v18  ;;  %189 = vmatprep.subr.mxu1 %v188_v48  ;;  %v206_v58 = vand.u32 4294901760, %v205_v49  ;;  %v2006_v60 = vsub.f32 %v60_v14, %v1876_v17  ;;  %v2122_v45 = vld [vmem:[%s3167_s1 + $0x60] sm:$0xff]  ;;  %v2138_v40 = vld [vmem:[%s3167_s1 + $0x48] sm:$0xff] }
   0xd   :  { %3299 = vst [vmem:[#allocation5_spill] sm:$0xff] %v1984_v51  ;;  %v217_v59 = vsub.f32 %v1957_v41, %v3175_v50  ;;  %v2009_v61 = vand.u32 4294901760, %v1976_v47  ;;  %95 = vmatpush1.msra.mxu0 %v1900_v23  ;;  %195 = vmatpush1.msra.mxu1 %v194_v53  ;;  %v2021_v1 = vsub.f32 %v57_v15, %v1878_v18  ;;  %v2024_v2 = vand.u32 4294901760, %v1989_v52  ;;  %v2043_v15 = vld [vmem:[%s3167_s1 + $0xa0] sm:$0xff]  ;;  %v2165_v30 = vld [vmem:[%s3167_s1 + $0x28] sm:$0xff] }
   0xe   :  { %v212_v63 = vand.u32 4294901760, %v211_v55  ;;  %v223_v0 = vsub.f32 %v1971_v46, %v3173_v56  ;;  %97 = vmatprep.subr.mxu0 %v1906_v25  ;;  %201 = vmatprep.subr.mxu1 %v200_v54  ;;  %v3171_v9 = vand.u32 4294901760, %v2006_v60  ;;  %v2035_v13 = vsub.f32 %v1886_v20, %v1900_v23 }
   0xf   :  { %3300 = vst [vmem:[#allocation6_spill] sm:$0xff] %v2009_v61  ;;  %3301 = vst [vmem:[#allocation7_spill] sm:$0xff] %v2024_v2  ;;  %v218_v8 = vand.u32 4294901760, %v217_v59  ;;  %v2038_v14 = vand.u32 4294901760, %v1999_v57  ;;  %99 = vmatpush1.msra.mxu0 %v1929_v31  ;;  %207 = vmatpush1.msra.mxu1 %v206_v58  ;;  %v3170_v43 = vand.u32 4294901760, %v2021_v1  ;;  %v2049_v44 = vsub.f32 %v1891_v21, %v1906_v25  ;;  %v2069_v21 = vld [vmem:[%s3167_s1 + $0x88] sm:$0xff] }
  0x10   :  { %v224_v39 = vand.u32 4294901760, %v223_v0  ;;  %v2052_v20 = vand.u32 4294901760, %v2014_v62  ;;  %101 = vmatprep.subr.mxu0 %v1935_v33  ;;  %213 = vmatprep.subr.mxu1 %v212_v63  ;;  %v229_v48 = vsub.f32 %v2006_v60, %v3171_v9  ;;  %v3172_v49 = vand.u32 4294901760, %v2035_v13 }
  0x11   :  { %3302 = vst [vmem:[#allocation8_spill] sm:$0xff] %v2038_v14  ;;  %v2061_v53 = vsub.f32 %v1896_v22, %v1929_v31  ;;  %v2064_v54 = vand.u32 4294901760, %v2029_v7  ;;  %103 = vmatpush1.msra.mxu0 %v1944_v37  ;;  %219 = vmatpush1.msra.mxu1 %v218_v8  ;;  %v235_v55 = vsub.f32 %v2021_v1, %v3170_v43  ;;  %v3174_v58 = vand.u32 4294901760, %v2049_v44 }
  0x12   :  { %3303 = vst [vmem:[#allocation9_spill] sm:$0xff] %v2052_v20  ;;  %v2078_v22 = vsub.f32 %v1914_v27, %v1935_v33  ;;  %v2081_v59 = vand.u32 4294901760, %v2043_v15  ;;  %105 = vmatprep.subr.mxu0 %v1960_v42  ;;  %225 = vmatprep.subr.mxu1 %v224_v39  ;;  %v230_v63 = vand.u32 4294901760, %v229_v48  ;;  %v241_v0 = vsub.f32 %v2035_v13, %v3172_v49  ;;  %v2095_v27 = vld [vmem:[%s3167_s1 + $0x80] sm:$0xff] }
  0x13   :  { %3304 = vst [vmem:[#allocation10_spill] sm:$0xff] %v2064_v54  ;;  %v3177_v8 = vand.u32 4294901760, %v2061_v53  ;;  %v2090_v43 = vsub.f32 %v1919_v28, %v1944_v37  ;;  %107 = vmatpush1.msra.mxu0 %v1984_v51  ;;  %v236_v9 = vand.u32 4294901760, %v235_v55  ;;  %v247_v39 = vsub.f32 %v2049_v44, %v3174_v58  ;;  %v2108_v28 = vld [vmem:[%s3167_s1 + $0x68] sm:$0xff] }
  0x14   :  { %3305 = vst [vmem:[#allocation11_spill] sm:$0xff] %v2081_v59  ;;  %v3179_v48 = vand.u32 4294901760, %v2078_v22  ;;  %v2103_v49 = vand.u32 4294901760, %v2069_v21  ;;  %231 = vmatpush1.msra.mxu1 %v230_v63  ;;  %109 = vmatprep.subr.mxu0 %v2009_v61  ;;  %v242_v56 = vand.u32 4294901760, %v241_v0  ;;  %v2117_v50 = vsub.f32 %v1924_v29, %v1960_v42 }
  0x15   :  { %v253_v55 = vsub.f32 %v2061_v53, %v3177_v8  ;;  %v3182_v58 = vand.u32 4294901760, %v2090_v43  ;;  %237 = vmatprep.subr.mxu1 %v236_v9  ;;  %111 = vmatpush1.msra.mxu0 %v2024_v2  ;;  %v248_v63 = vand.u32 4294901760, %v247_v39  ;;  %v2129_v8 = vand.u32 4294901760, %v2095_v27 }
  0x16   :  { %3306 = vst [vmem:[#allocation12_spill] sm:$0xff] %v2103_v49  ;;  %v259_v0 = vsub.f32 %v2078_v22, %v3179_v48  ;;  %v2133_v29 = vsub.f32 %v1949_v38, %v1984_v51  ;;  %243 = vmatpush1.msra.mxu1 %v242_v56  ;;  %113 = vmatprep.subr.mxu0 %v2038_v14  ;;  %v3188_v48 = vand.u32 4294901760, %v2117_v50  ;;  %v2146_v35 = vand.u32 4294901760, %v2108_v28  ;;  %v2151_v38 = vld [vmem:[%s3167_s1 + $0x40] sm:$0xff] }
  0x17   :  { %3307 = vst [vmem:[#allocation13_spill] sm:$0xff] %v2129_v8  ;;  %v254_v9 = vand.u32 4294901760, %v253_v55  ;;  %v265_v39 = vsub.f32 %v2090_v43, %v3182_v58  ;;  %249 = vmatprep.subr.mxu1 %v248_v63  ;;  %115 = vmatpush1.msra.mxu0 %v2052_v20  ;;  %v2157_v34 = vsub.f32 %v1976_v47, %v2009_v61  ;;  %v2160_v58 = vand.u32 4294901760, %v2122_v45 }
  0x18   :  { %3308 = vst [vmem:[#allocation14_spill] sm:$0xff] %v2146_v35  ;;  %v260_v56 = vand.u32 4294901760, %v259_v0  ;;  %v3189_v55 = vand.u32 4294901760, %v2133_v29  ;;  %117 = vmatprep.subr.mxu0 %v2064_v54  ;;  %v271_v0 = vsub.f32 %v2117_v50, %v3188_v48  ;;  %v2173_v47 = vsub.f32 %v1989_v52, %v2024_v2  ;;  %v2193_v52 = vld [vmem:[%s3167_s1 + $0x20] sm:$0xff] }
  0x19   :  { %3309 = vst [vmem:[#allocation15_spill] sm:$0xff] %v2160_v58  ;;  %255 = vmatpush1.msra.mxu1 %v254_v9  ;;  %v266_v63 = vand.u32 4294901760, %v265_v39  ;;  %v2176_v3 = vand.u32 4294901760, %v2138_v40  ;;  %119 = vmatpush1.msra.mxu0 %v2081_v59  ;;  %v2185_v61 = vsub.f32 %v1999_v57, %v2038_v14  ;;  %v2188_v48 = vand.u32 4294901760, %v2151_v38  ;;  %v2207_v14 = vld [vmem:[%s3167_s1 + $0x8] sm:$0xff] }
  0x1a   :  { %261 = vmatprep.subr.mxu1 %v260_v56  ;;  %v277_v9 = vsub.f32 %v2133_v29, %v3189_v55  ;;  %121 = vmatprep.subr.mxu0 %v2103_v49  ;;  %v272_v56 = vand.u32 4294901760, %v271_v0  ;;  %v2199_v39 = vsub.f32 %v2014_v62, %v2052_v20  ;;  %v2202_v57 = vand.u32 4294901760, %v2165_v30 }
  0x1b   :  { %3310 = vst [vmem:[#allocation16_spill] sm:$0xff] %v2176_v3  ;;  %3311 = vst [vmem:[#allocation17_spill] sm:$0xff] %v2188_v48  ;;  %267 = vmatpush1.msra.mxu1 %v266_v63  ;;  %123 = vmatpush1.msra.mxu0 %v2129_v8  ;;  %v3313_v2 = vand.u32 4294901760, %v2157_v34  ;;  %v3206_v55 = vand.u32 4294901760, %v2185_v61  ;;  %v2216_v62 = vsub.f32 %v2029_v7, %v2064_v54  ;;  %v3315_v20 = vand.u32 4294901760, %v2173_v47  ;;  %v2233_v7 = vld [vmem:[%s3167_s1] sm:$0xff] }
  0x1c   :  { %3312 = vst [vmem:[#allocation18_spill] sm:$0xff] %v2202_v57  ;;  %v278_v63 = vand.u32 4294901760, %v277_v9  ;;  %273 = vmatprep.subr.mxu1 %v272_v56  ;;  %125 = vmatprep.subr.mxu0 %v2146_v35  ;;  %v2224_v9 = vand.u32 4294901760, %v2193_v52  ;;  %v2241_v54 = vand.u32 4294901760, %v2207_v14 }
  0x1d   :  { %v283_v0 = vsub.f32 %v2157_v34, %v3313_v2  ;;  %3314 = vst [vmem:[#allocation19_spill] sm:$0xff] %v2216_v62  ;;  %v289_v51 = vsub.f32 %v2173_v47, %v3315_v20  ;;  %v2228_v2 = vsub.f32 %v2043_v15, %v2081_v59  ;;  %127 = vmatpush1.msra.mxu0 %v2160_v58  ;;  %v3316_v59 = vand.u32 4294901760, %v2199_v39 }
  0x1e   :  { %279 = vmatpush1.msra.mxu1 %v278_v63  ;;  %v295_v20 = vsub.f32 %v2185_v61, %v3206_v55  ;;  %129 = vmatprep.subr.mxu0 %v2176_v3  ;;  %v11_v55 = vld [vmem:[%s3168_s0] sm:$0x3]  ;;  %v2264_v63 = vsub.f32 %v2095_v27, %v2129_v8 }
  0x1f   :  { %v284_v56 = vand.u32 4294901760, %v283_v0  ;;  %v290_v15 = vand.u32 4294901760, %v289_v51  ;;  %v301_v37 = vsub.f32 %v2199_v39, %v3316_v59  ;;  %v2250_v0 = vsub.f32 %v2069_v21, %v2103_v49  ;;  %131 = vmatpush1.msra.mxu0 %v2188_v48 }
  0x20   :  { %v296_v42 = vand.u32 4294901760, %v295_v20  ;;  %v3317_v51 = vand.u32 4294901760, %v2216_v62  ;;  %v2260_v59 = vand.u32 4294901760, %v2233_v7  ;;  %133 = vmatprep.subr.mxu0 %v2202_v57  ;;  %v3216_v27 = vand.u32 4294901760, %v2264_v63 }
  0x21   :  { %285 = vmatprep.subr.mxu1 %v284_v56  ;;  %v302_v21 = vand.u32 4294901760, %v301_v37  ;;  %v3318_v56 = vand.u32 4294901760, %v2228_v2  ;;  %v3213_v49 = vand.u32 4294901760, %v2250_v0  ;;  %135 = vmatpush1.msra.mxu0 %v2224_v9  ;;  %v2281_v37 = vsub.f32 %v2122_v45, %v2160_v58 }
  0x22   :  { %v307_v33 = vsub.f32 %v2216_v62, %v3317_v51  ;;  %291 = vmatpush1.msra.mxu1 %v290_v15  ;;  %v2273_v51 = vsub.f32 %v2108_v28, %v2146_v35  ;;  %v2277_v15 = vand.u32 4294901760, %v11_v55  ;;  %137 = vmatprep.subr.mxu0 %v2241_v54  ;;  %v325_v45 = vsub.f32 %v2264_v63, %v3216_v27 }
  0x23   :  { %v313_v20 = vsub.f32 %v2228_v2, %v3318_v56  ;;  %297 = vmatprep.subr.mxu1 %v296_v42  ;;  %v319_v28 = vsub.f32 %v2250_v0, %v3213_v49  ;;  %v2290_v42 = vsub.f32 %v2138_v40, %v2176_v3  ;;  %139 = vmatpush1.msra.mxu0 %v2260_v59 }
  0x24   :  { %v308_v62 = vand.u32 4294901760, %v307_v33  ;;  %3319 = vst [vmem:[#allocation20_spill] sm:$0xff] %v2277_v15  ;;  %303 = vmatpush1.msra.mxu1 %v302_v21  ;;  %v2297_v21 = vsub.f32 %v11_v55, %v2277_v15  ;;  %v2302_v49 = vsub.f32 %v2151_v38, %v2188_v48  ;;  %v3321_v40 = vand.u32 4294901760, %v2273_v51  ;;  %418 = vmatprep.subr.mxu0 %v1881_v19 }
  0x25   :  { %v314_v56 = vand.u32 4294901760, %v313_v20  ;;  %v320_v33 = vand.u32 4294901760, %v319_v28  ;;  %v3223_v3 = vand.u32 4294901760, %v2290_v42  ;;  %v2311_v55 = vsub.f32 %v2165_v30, %v2202_v57 }
  0x26   :  { %309 = vmatprep.subr.mxu1 %v308_v62  ;;  %3320 = vst [vmem:[#allocation21_spill] sm:$0xff] %v2297_v21  ;;  %v331_v62 = vsub.f32 %v2273_v51, %v3321_v40  ;;  %v326_v27 = vand.u32 4294901760, %v325_v45  ;;  %v2314_v20 = vand.u32 4294901760, %v2297_v21  ;;  %v3323_v38 = vand.u32 4294901760, %v2281_v37 }
  0x27   :  { %315 = vmatpush1.msra.mxu1 %v314_v56  ;;  %v3224_v28 = vand.u32 4294901760, %v2302_v49  ;;  %v343_v48 = vsub.f32 %v2290_v42, %v3223_v3  ;;  %v3230_v58 = vand.u32 4294901760, %v2311_v55  ;;  %v2326_v30 = vsub.f32 %v2193_v52, %v2224_v9 }
  0x28   :  { %3322 = vst [vmem:[#allocation22_spill] sm:$0xff] %v2314_v20  ;;  %v337_v56 = vsub.f32 %v2281_v37, %v3323_v38  ;;  %321 = vmatprep.subr.mxu1 %v320_v33  ;;  %v332_v40 = vand.u32 4294901760, %v331_v62  ;;  %v176_v45 = vsub.f32 %v2297_v21, %v2314_v20  ;;  %v2335_v62 = vsub.f32 %v2207_v14, %v2241_v54 }
  0x29   :  { %3324 = vst [vmem:[#allocation23_spill] sm:$0xff] %v2326_v30  ;;  %327 = vmatpush1.msra.mxu1 %v326_v27  ;;  %v349_v33 = vsub.f32 %v2302_v49, %v3224_v28  ;;  %v344_v38 = vand.u32 4294901760, %v343_v48  ;;  %v355_v52 = vsub.f32 %v2311_v55, %v3230_v58  ;;  %v3229_v27 = vand.u32 4294901760, %v2326_v30  ;;  %v3339_v58 = vld [vmem:[#allocation12_spill] sm:$0xff] }
  0x2a   :  { %v338_v57 = vand.u32 4294901760, %v337_v56  ;;  %333 = vmatprep.subr.mxu1 %v332_v40  ;;  %v2343_v3 = vsub.f32 %v2233_v7, %v2260_v59  ;;  %v2345_v56 = vand.u32 4294901760, %v176_v45  ;;  %v3228_v20 = vand.u32 4294901760, %v2335_v62 }
  0x2b   :  { %v350_v28 = vand.u32 4294901760, %v349_v33  ;;  %v356_v14 = vand.u32 4294901760, %v355_v52  ;;  %v361_v48 = vsub.f32 %v2326_v30, %v3229_v27  ;;  %v3328_v52 = vld [vmem:[#allocation2_spill] sm:$0xff]  ;;  %v3338_v27 = vld [vmem:[#allocation11_spill] sm:$0xff] }
  0x2c   :  { %3325 = vst [vmem:[#allocation24_spill] sm:$0xff] %v2343_v3  ;;  %3326 = vst [vmem:[#allocation25_spill] sm:$0xff] %v2345_v56  ;;  %339 = vmatpush1.msra.mxu1 %v338_v57  ;;  %v3227_v40 = vand.u32 4294901760, %v2343_v3  ;;  %178 = vmatmul.mubr.f32.vlgmr.msra.gmra.mxu0 %v2345_v56  ;;  %v367_v7 = vsub.f32 %v2335_v62, %v3228_v20  ;;  %v3337_v20 = vld [vmem:[#allocation10_spill] sm:$0xff]  ;;  %v3340_v56 = vand.u32 4294901760, %v1881_v19  ;;  %v3348_v19 = vand.u32 4294901760, %v1941_v36 }
  0x2d   :  { %345 = vmatprep.subr.mxu1 %v344_v38  ;;  %421 = vmatpush1.msra.mxu0 %v1903_v24  ;;  %v362_v57 = vand.u32 4294901760, %v361_v48  ;;  %v3327_v38 = vmov 0.0   ;;  %v3330_v48 = vld [vmem:[#allocation3_spill] sm:$0xff] }
  0x2e   :  { %351 = vmatpush1.msra.mxu1 %v350_v28  ;;  %v373_v45 = vsub.f32 %v2343_v3, %v3227_v40  ;;  %424 = vmatprep.subr.mxu0 %v1909_v26  ;;  %v368_v33 = vand.u32 4294901760, %v367_v7  ;;  %v3331_v7 = vld [vmem:[#allocation4_spill] sm:$0xff]  ;;  %v3336_v40 = vld [vmem:[#allocation9_spill] sm:$0xff] }
  0x2f   :  { %357 = vmatprep.subr.mxu1 %v356_v14  ;;  %544 = vmatprep.mubr.f32.mxu0 %v3327_v38  ;;  %v3329_v14 = vld [vmem:[#allocation19_spill] sm:$0xff] }
  0x30   :  { %427 = vmatpush1.msra.mxu0 %v1932_v32  ;;  %363 = vmatpush1.msra.mxu1 %v362_v57  ;;  %v374_v28 = vand.u32 4294901760, %v373_v45  ;;  %v3332_v57 = vld [vmem:[#allocation5_spill] sm:$0xff]  ;;  %v3333_v45 = vld [vmem:[#allocation6_spill] sm:$0xff] }
  0x31   :  { %430 = vmatprep.subr.mxu0 %v1941_v36  ;;  %369 = vmatprep.subr.mxu1 %v368_v33  ;;  %v3334_v33 = vld [vmem:[#allocation7_spill] sm:$0xff]  ;;  %v3353_v36 = vand.u32 4294901760, %v2021_v1 }
  0x32   :  { %433 = vmatpush1.msra.mxu0 %v1957_v41  ;;  %375 = vmatpush1.msra.mxu1 %v374_v28  ;;  %v3335_v28 = vld [vmem:[#allocation8_spill] sm:$0xff] }
  0x33   :  { %436 = vmatprep.subr.mxu0 %v1971_v46  ;;  %410 = vmatmul.mubr.f32.vlgmr.msra.gmra.mxu1 %v2277_v15  ;;  %v3341_v15 = vld [vmem:[#allocation15_spill] sm:$0xff] }
  0x34   :  { %439 = vmatpush1.msra.mxu0 %v2006_v60  ;;  %554 = vmatprep.subr.mxu1 %v1843_v4 }
  0x35   :  { %442 = vmatprep.subr.mxu0 %v2021_v1  ;;  %556 = vmatpush1.msra.mxu1 %v1845_v5  ;;  %v3357_v1 = vand.u32 4294901760, %v2078_v22 }
  0x36   :  { %445 = vmatpush1.msra.mxu0 %v2035_v13  ;;  %558 = vmatprep.subr.mxu1 %v1847_v6 }
  0x37   :  { %448 = vmatprep.subr.mxu0 %v2049_v44  ;;  %560 = vmatpush1.msra.mxu1 %v1858_v10 }
  0x38   :  { %451 = vmatpush1.msra.mxu0 %v2061_v53  ;;  %562 = vmatprep.subr.mxu1 %v1860_v11 }
  0x39   :  { %454 = vmatprep.subr.mxu0 %v2078_v22  ;;  %564 = vmatpush1.msra.mxu1 %v1862_v12  ;;  %v62_v22 = vld [vmem:[%s3167_s1 + $0x190] sm:$0xff] }
  0x3a   :  { %457 = vmatpush1.msra.mxu0 %v2090_v43  ;;  %566 = vmatprep.subr.mxu1 %v1874_v16 }
  0x3b   :  { %460 = vmatprep.subr.mxu0 %v2117_v50  ;;  %568 = vmatpush1.msra.mxu1 %v1876_v17 }
  0x3c   :  { %463 = vmatpush1.msra.mxu0 %v2133_v29  ;;  %570 = vmatprep.subr.mxu1 %v1878_v18 }
  0x3d   :  { %466 = vmatprep.subr.mxu0 %v2157_v34  ;;  %572 = vmatpush1.msra.mxu1 %v1900_v23 }
  0x3e   :  { %469 = vmatpush1.msra.mxu0 %v2173_v47  ;;  %574 = vmatprep.subr.mxu1 %v1906_v25 }
  0x3f   :  { %472 = vmatprep.subr.mxu0 %v2185_v61  ;;  %576 = vmatpush1.msra.mxu1 %v1929_v31 }
  0x40   :  { %475 = vmatpush1.msra.mxu0 %v2199_v39  ;;  %578 = vmatprep.subr.mxu1 %v3328_v52 }
  0x41   :  { %478 = vmatprep.subr.mxu0 %v3329_v14  ;;  %580 = vmatpush1.msra.mxu1 %v3330_v48 }
  0x42   :  { %481 = vmatpush1.msra.mxu0 %v2228_v2  ;;  %582 = vmatprep.subr.mxu1 %v3331_v7 }
  0x43   :  { %484 = vmatprep.subr.mxu0 %v2250_v0  ;;  %584 = vmatpush1.msra.mxu1 %v3332_v57 }
  0x44   :  { %487 = vmatpush1.msra.mxu0 %v2264_v63  ;;  %586 = vmatprep.subr.mxu1 %v3333_v45 }
  0x45   :  { %490 = vmatprep.subr.mxu0 %v2273_v51  ;;  %588 = vmatpush1.msra.mxu1 %v3334_v33 }
  0x46   :  { %493 = vmatpush1.msra.mxu0 %v2281_v37  ;;  %590 = vmatprep.subr.mxu1 %v3335_v28 }
  0x47   :  { %496 = vmatprep.subr.mxu0 %v2290_v42  ;;  %592 = vmatpush1.msra.mxu1 %v3336_v40 }
  0x48   :  { %499 = vmatpush1.msra.mxu0 %v2302_v49  ;;  %594 = vmatprep.subr.mxu1 %v3337_v20 }
  0x49   :  { %502 = vmatprep.subr.mxu0 %v2311_v55  ;;  %596 = vmatpush1.msra.mxu1 %v3338_v27  ;;  %v3342_v27 = vand.u32 4294901760, %v1903_v24  ;;  %v3349_v24 = vand.u32 4294901760, %v1957_v41  ;;  %v3354_v41 = vand.u32 4294901760, %v2035_v13 }
  0x4a   :  { %505 = vmatpush1.msra.mxu0 %v2326_v30  ;;  %598 = vmatprep.subr.mxu1 %v3339_v58  ;;  %v3343_v30 = vld [vmem:[#allocation16_spill] sm:$0xff]  ;;  %v3344_v58 = vand.u32 4294901760, %v1909_v26  ;;  %v3350_v26 = vand.u32 4294901760, %v1971_v46  ;;  %v3355_v46 = vand.u32 4294901760, %v2049_v44 }
  0x4b   :  { %508 = vmatprep.subr.mxu0 %v2335_v62  ;;  %600 = vmatpush1.msra.mxu1 %v2129_v8  ;;  %v3345_v8 = vld [vmem:[#allocation17_spill] sm:$0xff] }
  0x4c   :  { %511 = vmatpush1.msra.mxu0 %v2343_v3  ;;  %602 = vmatprep.subr.mxu1 %v2146_v35  ;;  %v3346_v3 = vand.u32 4294901760, %v1932_v32  ;;  %v3347_v35 = vld [vmem:[#allocation18_spill] sm:$0xff] }
  0x4d   :  { %547 = vmatmul.mubr.f32.vlgmr.msra.gmra.mxu0 %v2297_v21  ;;  %662 = vmatprep.subr.mxu0 %v3340_v56  ;;  %v3352_v32 = vld [vmem:[#allocation22_spill] sm:$0xff] }
  0x4e   :  { %604 = vmatpush1.msra.mxu1 %v3341_v15  ;;  %666 = vmatpush1.msra.mxu0 %v3342_v27  ;;  %v3368_v27 = vand.u32 4294901760, %v2264_v63  ;;  %v58_v63 = vld [vmem:[%s3167_s1 + $0x170] sm:$0xff] }
  0x4f   :  { %606 = vmatprep.subr.mxu1 %v3343_v30  ;;  %670 = vmatprep.subr.mxu0 %v3344_v58 }
  0x50   :  { %608 = vmatpush1.msra.mxu1 %v3345_v8  ;;  %674 = vmatpush1.msra.mxu0 %v3346_v3  ;;  %v3351_v3 = vand.u32 4294901760, %v2006_v60  ;;  %v3356_v60 = vand.u32 4294901760, %v2061_v53  ;;  %v3366_v53 = vand.u32 4294901760, %v2228_v2 }
  0x51   :  { %610 = vmatprep.subr.mxu1 %v3347_v35  ;;  %678 = vmatprep.subr.mxu0 %v3348_v19  ;;  %v54_v19 = vld [vmem:[%s3167_s1 + $0x150] sm:$0xff] }
  0x52   :  { %612 = vmatpush1.msra.mxu1 %v2224_v9  ;;  %682 = vmatpush1.msra.mxu0 %v3349_v24  ;;  %v55_v24 = vld [vmem:[%s3167_s1 + $0x158] sm:$0xff] }
  0x53   :  { %614 = vmatprep.subr.mxu1 %v2241_v54  ;;  %686 = vmatprep.subr.mxu0 %v3350_v26 }
  0x54   :  { %616 = vmatpush1.msra.mxu1 %v2260_v59  ;;  %649 = vmatprep.mubr.f32.mxu1 %v3327_v38 }
  0x55   :  { %690 = vmatpush1.msra.mxu0 %v3351_v3  ;;  %653 = vmatmul.mubr.f32.vlgmr.msra.gmra.mxu1 %v3352_v32 }
  0x56   :  { %694 = vmatprep.subr.mxu0 %v3353_v36  ;;  %828 = vmatprep.subr.mxu1 %v1843_v4  ;;  %v3358_v4 = vand.u32 4294901760, %v2090_v43  ;;  %v3374_v36 = vand.u32 4294901760, %v2302_v49  ;;  %v50_v49 = vld [vmem:[%s3167_s1 + $0x130] sm:$0xff] }
  0x57   :  { %698 = vmatpush1.msra.mxu0 %v3354_v41  ;;  %830 = vmatpush1.msra.mxu1 %v1845_v5  ;;  %v3359_v5 = vand.u32 4294901760, %v2117_v50  ;;  %v3361_v50 = vand.u32 4294901760, %v2157_v34  ;;  %v71_v34 = vld [vmem:[%s3167_s1 + $0x1d8] sm:$0xff]  ;;  %v3376_v41 = vand.u32 4294901760, %v2311_v55 }
  0x58   :  { %702 = vmatprep.subr.mxu0 %v3355_v46  ;;  %832 = vmatprep.subr.mxu1 %v1847_v6  ;;  %v75_v6 = vld [vmem:[%s3167_s1 + $0x1f8] sm:$0xff]  ;;  %v2512_v58 = vand.u32 4294901760, %v71_v34 }
  0x59   :  { %706 = vmatpush1.msra.mxu0 %v3356_v60  ;;  %834 = vmatpush1.msra.mxu1 %v1858_v10  ;;  %v74_v10 = vld [vmem:[%s3167_s1 + $0x1f0] sm:$0xff]  ;;  %v2482_v13 = vand.u32 4294901760, %v75_v6 }
  0x5a   :  { %710 = vmatprep.subr.mxu0 %v3357_v1  ;;  %836 = vmatprep.subr.mxu1 %v1860_v11  ;;  %v3360_v11 = vand.u32 4294901760, %v2133_v29  ;;  %v2484_v43 = vand.u32 4294901760, %v74_v10  ;;  %v2586_v1 = vand.u32 4294901760, %v54_v19 }
  0x5b   :  { %714 = vmatpush1.msra.mxu0 %v3358_v4  ;;  %838 = vmatpush1.msra.mxu1 %v1862_v12  ;;  %v70_v12 = vld [vmem:[%s3167_s1 + $0x1d0] sm:$0xff]  ;;  %v2518_v29 = vsub.f32 %v75_v6, %v2482_v13  ;;  %v2604_v6 = vand.u32 4294901760, %v55_v24 }
  0x5c   :  { %718 = vmatprep.subr.mxu0 %v3359_v5  ;;  %840 = vmatprep.subr.mxu1 %v1874_v16  ;;  %v3362_v16 = vand.u32 4294901760, %v2173_v47  ;;  %v2492_v44 = vand.u32 4294901760, %v70_v12  ;;  %v3367_v47 = vand.u32 4294901760, %v2250_v0  ;;  %v3369_v0 = vand.u32 4294901760, %v2273_v51  ;;  %3378 = vst [vmem:[#allocation5_spill] sm:$0xff] %v2586_v1  ;;  %v3381_v5 = vld [vmem:[#allocation11_spill] sm:$0xff] }
  0x5d   :  { %722 = vmatpush1.msra.mxu0 %v3360_v11  ;;  %842 = vmatpush1.msra.mxu1 %v1876_v17  ;;  %v3363_v17 = vand.u32 4294901760, %v2185_v61  ;;  %v3365_v61 = vand.u32 4294901760, %v3329_v14  ;;  %v2539_v14 = vand.u32 4294901760, %v62_v22  ;;  %v3244_v51 = vand.u32 4294901760, %v2518_v29  ;;  %3382 = vst [vmem:[#allocation6_spill] sm:$0xff] %v2604_v6  ;;  %v51_v11 = vld [vmem:[%s3167_s1 + $0x138] sm:$0xff] }
  0x5e   :  { %726 = vmatprep.subr.mxu0 %v3361_v50  ;;  %844 = vmatprep.subr.mxu1 %v1878_v18  ;;  %v3364_v18 = vand.u32 4294901760, %v2199_v39  ;;  %v2524_v39 = vsub.f32 %v70_v12, %v2492_v44  ;;  %v3383_v12 = vand.u32 4294901760, %v2335_v62  ;;  %v3384_v50 = vld [vmem:[#allocation12_spill] sm:$0xff] }
  0x5f   :  { %730 = vmatpush1.msra.mxu0 %v3362_v16  ;;  %846 = vmatpush1.msra.mxu1 %v1900_v23  ;;  %v67_v23 = vld [vmem:[%s3167_s1 + $0x1b8] sm:$0xff]  ;;  %3370 = vst [vmem:[#allocation2_spill] sm:$0xff] %v2539_v14  ;;  %v2582_v46 = vsub.f32 %v62_v22, %v2539_v14 }
  0x60   :  { %734 = vmatprep.subr.mxu0 %v3363_v17  ;;  %848 = vmatprep.subr.mxu1 %v1906_v25  ;;  %v66_v25 = vld [vmem:[%s3167_s1 + $0x1b0] sm:$0xff]  ;;  %v2526_v2 = vand.u32 4294901760, %v67_v23  ;;  %v3241_v26 = vand.u32 4294901760, %v2524_v39  ;;  %v3388_v22 = vld [vmem:[#allocation13_spill] sm:$0xff] }
  0x61   :  { %738 = vmatpush1.msra.mxu0 %v3364_v18  ;;  %850 = vmatpush1.msra.mxu1 %v1929_v31  ;;  %v2510_v31 = vsub.f32 %v74_v10, %v2484_v43  ;;  %v2531_v56 = vand.u32 4294901760, %v66_v25  ;;  %v3385_v18 = vld [vmem:[#allocation24_spill] sm:$0xff] }
  0x62   :  { %742 = vmatprep.subr.mxu0 %v3365_v61  ;;  %852 = vmatprep.subr.mxu1 %v3328_v52  ;;  %v63_v52 = vld [vmem:[%s3167_s1 + $0x198] sm:$0xff]  ;;  %v2568_v3 = vsub.f32 %v67_v23, %v2526_v2  ;;  %v2616_v16 = vsub.f32 %v2524_v39, %v3241_v26  ;;  %v3386_v23 = vand.u32 4294901760, %v3385_v18  ;;  %v2628_v61 = vand.u32 4294901760, %v50_v49 }
  0x63   :  { %746 = vmatpush1.msra.mxu0 %v3366_v53  ;;  %854 = vmatpush1.msra.mxu1 %v3330_v48  ;;  %v3371_v48 = vand.u32 4294901760, %v2281_v37  ;;  %v3372_v37 = vand.u32 4294901760, %v2290_v42  ;;  %v2574_v42 = vsub.f32 %v66_v25, %v2531_v56  ;;  %v47_v53 = vld [vmem:[%s3167_s1 + $0x118] sm:$0xff] }
  0x64   :  { %750 = vmatprep.subr.mxu0 %v3367_v47  ;;  %856 = vmatprep.subr.mxu1 %v3331_v7  ;;  %v59_v7 = vld [vmem:[%s3167_s1 + $0x178] sm:$0xff]  ;;  %v3239_v17 = vand.u32 4294901760, %v2568_v3  ;;  %3387 = vst [vmem:[#allocation7_spill] sm:$0xff] %v2628_v61  ;;  %v3389_v47 = vld [vmem:[#allocation20_spill] sm:$0xff] }
  0x65   :  { %754 = vmatpush1.msra.mxu0 %v3368_v27  ;;  %858 = vmatpush1.msra.mxu1 %v3332_v57  ;;  %v3243_v57 = vand.u32 4294901760, %v2510_v31  ;;  %v2584_v60 = vand.u32 4294901760, %v59_v7  ;;  %v3238_v25 = vand.u32 4294901760, %v2574_v42  ;;  %v2637_v27 = vsub.f32 %v54_v19, %v2586_v1  ;;  %v31_v19 = vld [vmem:[%s3167_s1 + $0x98] sm:$0xff] }
  0x66   :  { %758 = vmatprep.subr.mxu0 %v3369_v0  ;;  %860 = vmatprep.subr.mxu1 %v3333_v45  ;;  %v2553_v45 = vsub.f32 %v71_v34, %v2512_v58  ;;  %v46_v0 = vld [vmem:[%s3167_s1 + $0x110] sm:$0xff] }
  0x67   :  { %762 = vmatpush1.msra.mxu0 %v3371_v48  ;;  %862 = vmatpush1.msra.mxu1 %v3334_v33  ;;  %v2561_v33 = vand.u32 4294901760, %v63_v52  ;;  %3377 = vst [vmem:[#allocation4_spill] sm:$0xff] %v2584_v60  ;;  %v2602_v55 = vsub.f32 %v2510_v31, %v3243_v57  ;;  %v2646_v48 = vsub.f32 %v59_v7, %v2584_v60  ;;  %v2687_v18 = vand.u32 4294901760, %v46_v0 }
  0x68   :  { %766 = vmatprep.subr.mxu0 %v3372_v37  ;;  %864 = vmatprep.subr.mxu1 %v3335_v28  ;;  %v2576_v28 = vand.u32 4294901760, %v58_v63  ;;  %v3242_v10 = vand.u32 4294901760, %v2553_v45  ;;  %v3391_v37 = vld [vmem:[#allocation14_spill] sm:$0xff]  ;;  %v2661_v7 = vsub.f32 %v55_v24, %v2604_v6  ;;  %v38_v24 = vld [vmem:[%s3167_s1 + $0xd0] sm:$0xff] }
  0x69   :  { %3373 = vst [vmem:[#allocation19_spill] sm:$0xff] %v2561_v33  ;;  %770 = vmatpush1.msra.mxu0 %v3374_v36  ;;  %866 = vmatpush1.msra.mxu1 %v3336_v40  ;;  %v3379_v40 = vld [vmem:[#allocation23_spill] sm:$0xff]  ;;  %v2620_v34 = vsub.f32 %v63_v52, %v2561_v33  ;;  %v2639_v52 = vand.u32 4294901760, %v51_v11  ;;  %3393 = vst [vmem:[#allocation10_spill] sm:$0xff] %v2687_v18  ;;  %v2713_v26 = vand.u32 4294901760, %v38_v24 }
  0x6a   :  { %3375 = vst [vmem:[#allocation3_spill] sm:$0xff] %v2576_v28  ;;  %774 = vmatprep.subr.mxu0 %v3376_v41  ;;  %868 = vmatprep.subr.mxu1 %v3337_v20  ;;  %v3380_v4 = vand.u32 4294901760, %v3379_v40  ;;  %v2597_v20 = vsub.f32 %v2518_v29, %v3244_v51  ;;  %v2626_v62 = vsub.f32 %v58_v63, %v2576_v28  ;;  %v3240_v63 = vand.u32 4294901760, %v2582_v46  ;;  %v42_v40 = vld [vmem:[%s3167_s1 + $0xf0] sm:$0xff] }
  0x6b   :  { %870 = vmatpush1.msra.mxu1 %v3381_v5  ;;  %819 = vmatprep.mubr.f32.mxu0 %v3327_v38  ;;  %3390 = vst [vmem:[#allocation8_spill] sm:$0xff] %v2639_v52  ;;  %v2655_v41 = vsub.f32 %v2553_v45, %v3242_v10  ;;  %v2669_v5 = vsub.f32 %v2568_v3, %v3239_v17  ;;  %3395 = vst [vmem:[#allocation16_spill] sm:$0xff] %v2713_v26  ;;  %v3250_v10 = vand.u32 4294901760, %v2637_v27 }
  0x6c   :  { %778 = vmatpush1.msra.mxu0 %v3380_v4  ;;  %872 = vmatprep.subr.mxu1 %v3384_v50  ;;  %v1043_v36 = vand.u32 4294901760, %v2597_v20  ;;  %v2671_v20 = vand.u32 4294901760, %v47_v53  ;;  %v2685_v50 = vsub.f32 %v2574_v42, %v3238_v25  ;;  %v39_v25 = vld [vmem:[%s3167_s1 + $0xd8] sm:$0xff]  ;;  %v2707_v17 = vsub.f32 %v51_v11, %v2639_v52  ;;  %v34_v4 = vld [vmem:[%s3167_s1 + $0xb0] sm:$0xff] }
  0x6d   :  { %782 = vmatprep.subr.mxu0 %v3383_v12  ;;  %874 = vmatpush1.msra.mxu1 %v3388_v22  ;;  %v3245_v12 = vand.u32 4294901760, %v2620_v34  ;;  %v3246_v22 = vand.u32 4294901760, %v2626_v62  ;;  %v1067_v57 = vand.u32 4294901760, %v2669_v5  ;;  %v2733_v51 = vsub.f32 %v46_v0, %v2687_v18 }
  0x6e   :  { %786 = vmatpush1.msra.mxu0 %v3386_v23  ;;  %876 = vmatprep.subr.mxu1 %v3391_v37  ;;  %3392 = vst [vmem:[#allocation9_spill] sm:$0xff] %v2671_v20  ;;  %v43_v23 = vld [vmem:[%s3167_s1 + $0xf8] sm:$0xff]  ;;  %v2701_v37 = vand.u32 4294901760, %v42_v40 }
  0x6f   :  { %821 = vmatmul.mubr.f32.vlgmr.msra.gmra.mxu0 %v3389_v47  ;;  %932 = vmatprep.subr.mxu0 %v2482_v13  ;;  %v2724_v11 = vand.u32 4294901760, %v43_v23  ;;  %v2738_v5 = vsub.f32 %v2626_v62, %v3246_v22  ;;  %v3401_v22 = vand.u32 4294901760, %v2602_v55  ;;  %v3404_v55 = vand.u32 4294901760, %v2707_v17 }
  0x70   :  { %878 = vmatpush1.msra.mxu1 %v3341_v15  ;;  %934 = vmatpush1.msra.mxu0 %v2484_v43  ;;  %v2680_v15 = vsub.f32 %v50_v49, %v2628_v61  ;;  %v3247_v49 = vand.u32 4294901760, %v2646_v48  ;;  %3394 = vst [vmem:[#allocation15_spill] sm:$0xff] %v2701_v37 }
  0x71   :  { %880 = vmatprep.subr.mxu1 %v3343_v30  ;;  %936 = vmatprep.subr.mxu0 %v2512_v58  ;;  %v2698_v30 = vsub.f32 %v2582_v46, %v3240_v63  ;;  %v3248_v63 = vand.u32 4294901760, %v2661_v7  ;;  %3396 = vst [vmem:[#allocation17_spill] sm:$0xff] %v2724_v11  ;;  %v2788_v21 = vsub.f32 %v43_v23, %v2724_v11  ;;  %v27_v23 = vld [vmem:[%s3167_s1 + $0x78] sm:$0xff] }
  0x72   :  { %882 = vmatpush1.msra.mxu1 %v3345_v8  ;;  %938 = vmatpush1.msra.mxu0 %v2492_v44  ;;  %v1055_v8 = vand.u32 4294901760, %v2655_v41  ;;  %v2727_v41 = vsub.f32 %v47_v53, %v2671_v20  ;;  %v35_v53 = vld [vmem:[%s3167_s1 + $0xb8] sm:$0xff]  ;;  %v2751_v0 = vsub.f32 %v2646_v48, %v3247_v49  ;;  %v2776_v49 = vsub.f32 %v2637_v27, %v3250_v10  ;;  %v26_v10 = vld [vmem:[%s3167_s1 + $0x70] sm:$0xff] }
  0x73   :  { %884 = vmatprep.subr.mxu1 %v3347_v35  ;;  %940 = vmatprep.subr.mxu0 %v2526_v2  ;;  %v2722_v35 = vsub.f32 %v2620_v34, %v3245_v12  ;;  %v2740_v12 = vand.u32 4294901760, %v39_v25  ;;  %v2784_v32 = vand.u32 4294901760, %v35_v53 }
  0x74   :  { %886 = vmatpush1.msra.mxu1 %v2224_v9  ;;  %942 = vmatpush1.msra.mxu0 %v2531_v56  ;;  %3397 = vst [vmem:[#allocation18_spill] sm:$0xff] %v2727_v41  ;;  %v1073_v9 = vand.u32 4294901760, %v2685_v50  ;;  %v2754_v50 = vsub.f32 %v42_v40, %v2701_v37  ;;  %v2771_v40 = vsub.f32 %v38_v24, %v2713_v26  ;;  %v3406_v24 = vand.u32 4294901760, %v2616_v16 }
  0x75   :  { %888 = vmatprep.subr.mxu1 %v2241_v54  ;;  %944 = vmatprep.subr.mxu0 %v2561_v33  ;;  %3398 = vst [vmem:[#allocation23_spill] sm:$0xff] %v2740_v12  ;;  %v1085_v54 = vand.u32 4294901760, %v2698_v30  ;;  %v2768_v30 = vsub.f32 %v2661_v7, %v3248_v63  ;;  %v1079_v63 = vand.u32 4294901760, %v2722_v35  ;;  %3400 = vst [vmem:[#allocation12_spill] sm:$0xff] %v2784_v32  ;;  %v3408_v16 = vand.u32 4294901760, %v2727_v41 }
  0x76   :  { %890 = vmatpush1.msra.mxu1 %v2260_v59  ;;  %923 = vmatprep.mubr.f32.mxu1 %v3327_v38  ;;  %3399 = vst [vmem:[#allocation11_spill] sm:$0xff] %v2754_v50  ;;  %v30_v59 = vld [vmem:[%s3167_s1 + $0x90] sm:$0xff] }
  0x77   :  { %946 = vmatpush1.msra.mxu0 %v2539_v14  ;;  %925 = vmatmul.mubr.f32.vlgmr.msra.gmra.mxu1 %v3389_v47  ;;  %v2799_v35 = vand.u32 4294901760, %v30_v59  ;;  %v2815_v14 = vsub.f32 %v39_v25, %v2740_v12  ;;  %v22_v25 = vld [vmem:[%s3167_s1 + $0x50] sm:$0xff] }
  0x78   :  { %948 = vmatprep.subr.mxu0 %v2584_v60  ;;  %1044 = vmatprep.subr.mxu1 %v1043_v36  ;;  %v1097_v36 = vand.u32 4294901760, %v2738_v5  ;;  %v2797_v60 = vand.u32 4294901760, %v34_v4  ;;  %v2812_v5 = vand.u32 4294901760, %v31_v19 }
  0x79   :  { %950 = vmatpush1.msra.mxu0 %v2576_v28  ;;  %1050 = vmatpush1.msra.mxu1 %v3401_v22  ;;  %3403 = vst [vmem:[#allocation13_spill] sm:$0xff] %v2799_v35  ;;  %v1091_v28 = vand.u32 4294901760, %v2751_v0  ;;  %v2810_v22 = vsub.f32 %v2707_v17, %v3404_v55  ;;  %3405 = vst [vmem:[#allocation14_spill] sm:$0xff] %v2815_v14  ;;  %v3407_v0 = vand.u32 4294901760, %v2680_v15  ;;  %v2827_v55 = vand.u32 4294901760, %v26_v10 }
  0x7a   :  { %3402 = vst [vmem:[#allocation24_spill] sm:$0xff] %v2797_v60  ;;  %952 = vmatprep.subr.mxu0 %v2604_v6  ;;  %1056 = vmatprep.subr.mxu1 %v1055_v8  ;;  %v1103_v6 = vand.u32 4294901760, %v2768_v30  ;;  %v1109_v8 = vand.u32 4294901760, %v2776_v49  ;;  %v2836_v30 = vsub.f32 %v2727_v41, %v3408_v16  ;;  %v2838_v49 = vand.u32 4294901760, %v27_v23  ;;  %v18_v41 = vld [vmem:[%s3167_s1 + $0x30] sm:$0xff] }
  0x7b   :  { %954 = vmatpush1.msra.mxu0 %v2586_v1  ;;  %1062 = vmatpush1.msra.mxu1 %v3406_v24  ;;  %v2825_v33 = vsub.f32 %v2680_v15, %v3407_v0  ;;  %v23_v0 = vld [vmem:[%s3167_s1 + $0x58] sm:$0xff]  ;;  %v2845_v1 = vsub.f32 %v35_v53, %v2784_v32  ;;  %v2852_v16 = vsub.f32 %v30_v59, %v2799_v35  ;;  %v1115_v53 = vand.u32 4294901760, %v2810_v22 }
  0x7c   :  { %956 = vmatprep.subr.mxu0 %v2639_v52  ;;  %1068 = vmatprep.subr.mxu1 %v1067_v57  ;;  %v2849_v57 = vsub.f32 %v34_v4, %v2797_v60  ;;  %v3410_v52 = vand.u32 4294901760, %v2733_v51  ;;  %v19_v4 = vld [vmem:[%s3167_s1 + $0x38] sm:$0xff]  ;;  %v2867_v59 = vsub.f32 %v31_v19, %v2812_v5  ;;  %v2874_v22 = vand.u32 4294901760, %v23_v0 }
  0x7d   :  { %958 = vmatpush1.msra.mxu0 %v2628_v61  ;;  %1074 = vmatpush1.msra.mxu1 %v1073_v9  ;;  %3409 = vst [vmem:[#allocation26_spill] sm:$0xff] %v2852_v16  ;;  %v2861_v9 = vand.u32 4294901760, %v22_v25  ;;  %v1127_v19 = vand.u32 4294901760, %v2836_v30  ;;  %v2890_v61 = vsub.f32 %v27_v23, %v2838_v49  ;;  %v3413_v23 = vand.u32 4294901760, %v2815_v14 }
  0x7e   :  { %v1132_v24 = vsub.f32 %v2733_v51, %v3410_v52  ;;  %960 = vmatprep.subr.mxu0 %v2671_v20  ;;  %1080 = vmatprep.subr.mxu1 %v1079_v63  ;;  %v1121_v52 = vand.u32 4294901760, %v2825_v33  ;;  %v2872_v63 = vsub.f32 %v26_v10, %v2827_v55  ;;  %v2896_v20 = vand.u32 4294901760, %v19_v4  ;;  %v14_v10 = vld [vmem:[%s3167_s1 + $0x10] sm:$0xff] }
  0x7f   :  { %962 = vmatpush1.msra.mxu0 %v2687_v18  ;;  %1086 = vmatpush1.msra.mxu1 %v1085_v54  ;;  %v3411_v54 = vand.u32 4294901760, %v2788_v21  ;;  %v15_v18 = vld [vmem:[%s3167_s1 + $0x18] sm:$0xff] }
  0x80   :  { %964 = vmatprep.subr.mxu0 %v2724_v11  ;;  %1092 = vmatprep.subr.mxu1 %v1091_v28  ;;  %v1133_v11 = vand.u32 4294901760, %v1132_v24  ;;  %v3412_v28 = vand.u32 4294901760, %v2754_v50  ;;  %v2907_v24 = vsub.f32 %v22_v25, %v2861_v9 }
  0x81   :  { %v1138_v33 = vsub.f32 %v2788_v21, %v3411_v54  ;;  %966 = vmatpush1.msra.mxu0 %v2701_v37  ;;  %1098 = vmatpush1.msra.mxu1 %v1097_v36  ;;  %v1150_v36 = vsub.f32 %v2815_v14, %v3413_v23  ;;  %v2909_v37 = vand.u32 4294901760, %v18_v41  ;;  %v3415_v54 = vand.u32 4294901760, %v2771_v40 }
  0x82   :  { %v1144_v30 = vsub.f32 %v2754_v50, %v3412_v28  ;;  %968 = vmatprep.subr.mxu0 %v2740_v12  ;;  %1104 = vmatprep.subr.mxu1 %v1103_v6  ;;  %3414 = vst [vmem:[#allocation27_spill] sm:$0xff] %v2907_v24  ;;  %v2916_v12 = vand.u32 4294901760, %v15_v18  ;;  %v2920_v23 = vsub.f32 %v23_v0, %v2874_v22  ;;  %v3416_v28 = vand.u32 4294901760, %v2845_v1 }
  0x83   :  { %970 = vmatpush1.msra.mxu0 %v2713_v26  ;;  %1110 = vmatpush1.msra.mxu1 %v1109_v8  ;;  %v1156_v50 = vsub.f32 %v2771_v40, %v3415_v54  ;;  %v1139_v25 = vand.u32 4294901760, %v1138_v33  ;;  %v2926_v8 = vand.u32 4294901760, %v14_v10  ;;  %v3417_v6 = vand.u32 4294901760, %v2849_v57 }
  0x84   :  { %972 = vmatprep.subr.mxu0 %v2784_v32  ;;  %1116 = vmatprep.subr.mxu1 %v1115_v53  ;;  %v1162_v26 = vsub.f32 %v2845_v1, %v3416_v28  ;;  %v1145_v54 = vand.u32 4294901760, %v1144_v30  ;;  %v2934_v32 = vsub.f32 %v19_v4, %v2896_v20  ;;  %v1151_v53 = vand.u32 4294901760, %v1150_v36 }
  0x85   :  { %974 = vmatpush1.msra.mxu0 %v2797_v60  ;;  %1122 = vmatpush1.msra.mxu1 %v1121_v52  ;;  %v1168_v0 = vsub.f32 %v2849_v57, %v3417_v6  ;;  %v2938_v33 = vsub.f32 %v18_v41, %v2909_v37  ;;  %v3418_v28 = vand.u32 4294901760, %v2867_v59  ;;  %v1157_v30 = vand.u32 4294901760, %v1156_v50 }
  0x86   :  { %976 = vmatprep.subr.mxu0 %v2812_v5  ;;  %1128 = vmatprep.subr.mxu1 %v1127_v19  ;;  %v3419_v4 = vand.u32 4294901760, %v2852_v16  ;;  %v2950_v36 = vsub.f32 %v15_v18, %v2916_v12  ;;  %v1163_v41 = vand.u32 4294901760, %v1162_v26  ;;  %v3421_v52 = vand.u32 4294901760, %v2890_v61 }
  0x87   :  { %v1174_v14 = vsub.f32 %v2867_v59, %v3418_v28  ;;  %978 = vmatpush1.msra.mxu0 %v2799_v35  ;;  %1134 = vmatpush1.msra.mxu1 %v1133_v11  ;;  %v2954_v28 = vsub.f32 %v14_v10, %v2926_v8  ;;  %v3289_v18 = vand.u32 4294901760, %v2934_v32  ;;  %v3422_v26 = vand.u32 4294901760, %v2872_v63 }
  0x88   :  { %v1180_v6 = vsub.f32 %v2852_v16, %v3419_v4  ;;  %980 = vmatprep.subr.mxu0 %v2838_v49  ;;  %1140 = vmatprep.subr.mxu1 %v1139_v25  ;;  %v1186_v11 = vsub.f32 %v2890_v61, %v3421_v52  ;;  %v1169_v4 = vand.u32 4294901760, %v1168_v0  ;;  %v3423_v50 = vand.u32 4294901760, %v2920_v23 }
  0x89   :  { %3420 = vst [vmem:[#allocation28_spill] sm:$0xff] %v2954_v28  ;;  %982 = vmatpush1.msra.mxu0 %v2827_v55  ;;  %1146 = vmatpush1.msra.mxu1 %v1145_v54  ;;  %v1175_v25 = vand.u32 4294901760, %v1174_v14  ;;  %v1192_v10 = vsub.f32 %v2872_v63, %v3422_v26  ;;  %v3288_v0 = vand.u32 4294901760, %v2950_v36  ;;  %v3287_v19 = vand.u32 4294901760, %v2954_v28 }
  0x8a   :  { %984 = vmatprep.subr.mxu0 %v2874_v22  ;;  %1152 = vmatprep.subr.mxu1 %v1151_v53  ;;  %v1181_v52 = vand.u32 4294901760, %v1180_v6  ;;  %v1198_v54 = vsub.f32 %v2920_v23, %v3423_v50  ;;  %v1187_v14 = vand.u32 4294901760, %v1186_v11  ;;  %v3424_v53 = vand.u32 4294901760, %v2907_v24 }
  0x8b   :  { %986 = vmatpush1.msra.mxu0 %v2861_v9  ;;  %1158 = vmatpush1.msra.mxu1 %v1157_v30  ;;  %v1210_v30 = vsub.f32 %v2934_v32, %v3289_v18  ;;  %v1193_v6 = vand.u32 4294901760, %v1192_v10  ;;  %v3426_v10 = vld [vmem:[#allocation25_spill] sm:$0xff]  ;;  %v3442_v18 = vld [vmem:[#allocation23_spill] sm:$0xff] }
  0x8c   :  { %988 = vmatprep.subr.mxu0 %v2896_v20  ;;  %1164 = vmatprep.subr.mxu1 %v1163_v41  ;;  %v1204_v26 = vsub.f32 %v2907_v24, %v3424_v53  ;;  %v3425_v41 = vand.u32 4294901760, %v2938_v33  ;;  %v1199_v50 = vand.u32 4294901760, %v1198_v54 }
  0x8d   :  { %990 = vmatpush1.msra.mxu0 %v2909_v37  ;;  %1170 = vmatpush1.msra.mxu1 %v1169_v4  ;;  %v1222_v4 = vsub.f32 %v2950_v36, %v3288_v0  ;;  %v3441_v0 = vld [vmem:[#allocation15_spill] sm:$0xff] }
  0x8e   :  { %992 = vmatprep.subr.mxu0 %v2916_v12  ;;  %1176 = vmatprep.subr.mxu1 %v1175_v25  ;;  %v1216_v11 = vsub.f32 %v2938_v33, %v3425_v41  ;;  %v1205_v53 = vand.u32 4294901760, %v1204_v26  ;;  %v1228_v25 = vsub.f32 %v2954_v28, %v3287_v19  ;;  %v1211_v41 = vand.u32 4294901760, %v1210_v30  ;;  %v3427_v26 = vld [vmem:[#allocation18_spill] sm:$0xff]  ;;  %v3428_v30 = vld [vmem:[#allocation19_spill] sm:$0xff]  ;;  %v3440_v19 = vld [vmem:[#allocation17_spill] sm:$0xff] }
  0x8f   :  { %994 = vmatpush1.msra.mxu0 %v2926_v8  ;;  %1182 = vmatpush1.msra.mxu1 %v1181_v52  ;;  %v1223_v54 = vand.u32 4294901760, %v1222_v4  ;;  %v3432_v4 = vld [vmem:[#allocation3_spill] sm:$0xff] }
  0x90   :  { %1027 = vmatprep.mubr.f32.mxu0 %v3327_v38  ;;  %1188 = vmatprep.subr.mxu1 %v1187_v14  ;;  %v1217_v52 = vand.u32 4294901760, %v1216_v11  ;;  %v1229_v14 = vand.u32 4294901760, %v1228_v25  ;;  %v3430_v11 = vld [vmem:[#allocation4_spill] sm:$0xff]  ;;  %v3434_v25 = vld [vmem:[#allocation6_spill] sm:$0xff] }
  0x91   :  { %1273 = vmatprep.subr.mxu0 %v2518_v29  ;;  %1033 = vmatmul.mubr.f32.vlgmr.msra.gmra.mxu0 %v3426_v10  ;;  %v3435_v10 = vld [vmem:[#allocation5_spill] sm:$0xff] }
  0x92   :  { %1194 = vmatpush1.msra.mxu1 %v1193_v6  ;;  %1276 = vmatpush1.msra.mxu0 %v2510_v31  ;;  %v3429_v6 = vld [vmem:[#allocation2_spill] sm:$0xff] }
  0x93   :  { %1200 = vmatprep.subr.mxu1 %v1199_v50  ;;  %1279 = vmatprep.subr.mxu0 %v2553_v45  ;;  %v3431_v50 = vld [vmem:[#allocation11_spill] sm:$0xff] }
  0x94   :  { %1206 = vmatpush1.msra.mxu1 %v1205_v53  ;;  %1282 = vmatpush1.msra.mxu0 %v2524_v39  ;;  %v3433_v53 = vld [vmem:[#allocation14_spill] sm:$0xff] }
  0x95   :  { %1212 = vmatprep.subr.mxu1 %v1211_v41  ;;  %1285 = vmatprep.subr.mxu0 %v2568_v3  ;;  %v3436_v41 = vld [vmem:[#allocation8_spill] sm:$0xff] }
  0x96   :  { %1218 = vmatpush1.msra.mxu1 %v1217_v52  ;;  %1288 = vmatpush1.msra.mxu0 %v2574_v42  ;;  %v3437_v52 = vld [vmem:[#allocation7_spill] sm:$0xff] }
  0x97   :  { %1224 = vmatprep.subr.mxu1 %v1223_v54  ;;  %1291 = vmatprep.subr.mxu0 %v2620_v34  ;;  %v3438_v54 = vld [vmem:[#allocation9_spill] sm:$0xff] }
  0x98   :  { %1230 = vmatpush1.msra.mxu1 %v1229_v14  ;;  %1263 = vmatprep.mubr.f32.mxu1 %v3327_v38  ;;  %v3439_v14 = vld [vmem:[#allocation10_spill] sm:$0xff] }
  0x99   :  { %1294 = vmatpush1.msra.mxu0 %v2582_v46  ;;  %1265 = vmatmul.mubr.f32.vlgmr.msra.gmra.mxu1 %v3389_v47  ;;  %v3443_v47 = vld [vmem:[#allocation16_spill] sm:$0xff] }
  0x9a   :  { %1297 = vmatprep.subr.mxu0 %v2646_v48  ;;  %1409 = vmatprep.subr.mxu1 %v2482_v13 }
  0x9b   :  { %1300 = vmatpush1.msra.mxu0 %v2626_v62  ;;  %1411 = vmatpush1.msra.mxu1 %v2484_v43 }
  0x9c   :  { %1303 = vmatprep.subr.mxu0 %v2661_v7  ;;  %1413 = vmatprep.subr.mxu1 %v2512_v58 }
  0x9d   :  { %1306 = vmatpush1.msra.mxu0 %v2637_v27  ;;  %1415 = vmatpush1.msra.mxu1 %v2492_v44 }
  0x9e   :  { %1309 = vmatprep.subr.mxu0 %v2707_v17  ;;  %1417 = vmatprep.subr.mxu1 %v2526_v2 }
  0x9f   :  { %1312 = vmatpush1.msra.mxu0 %v2680_v15  ;;  %1419 = vmatpush1.msra.mxu1 %v2531_v56 }
  0xa0   :  { %1315 = vmatprep.subr.mxu0 %v3427_v26  ;;  %1421 = vmatprep.subr.mxu1 %v3428_v30 }
  0xa1   :  { %1318 = vmatpush1.msra.mxu0 %v2733_v51  ;;  %1423 = vmatpush1.msra.mxu1 %v3429_v6 }
  0xa2   :  { %1321 = vmatprep.subr.mxu0 %v2788_v21  ;;  %1425 = vmatprep.subr.mxu1 %v3430_v11 }
  0xa3   :  { %1324 = vmatpush1.msra.mxu0 %v3431_v50  ;;  %1427 = vmatpush1.msra.mxu1 %v3432_v4 }
  0xa4   :  { %1327 = vmatprep.subr.mxu0 %v3433_v53  ;;  %1429 = vmatprep.subr.mxu1 %v3434_v25 }
  0xa5   :  { %1330 = vmatpush1.msra.mxu0 %v2771_v40  ;;  %1431 = vmatpush1.msra.mxu1 %v3435_v10 }
  0xa6   :  { %1333 = vmatprep.subr.mxu0 %v2845_v1  ;;  %1433 = vmatprep.subr.mxu1 %v3436_v41 }
  0xa7   :  { %1336 = vmatpush1.msra.mxu0 %v2849_v57  ;;  %1435 = vmatpush1.msra.mxu1 %v3437_v52 }
  0xa8   :  { %1339 = vmatprep.subr.mxu0 %v2867_v59  ;;  %1437 = vmatprep.subr.mxu1 %v3438_v54 }
  0xa9   :  { %1342 = vmatpush1.msra.mxu0 %v2852_v16  ;;  %1439 = vmatpush1.msra.mxu1 %v3439_v14  ;;  %v3444_v16 = vld [vmem:[#allocation12_spill] sm:$0xff] }
  0xaa   :  { %1345 = vmatprep.subr.mxu0 %v2890_v61  ;;  %1441 = vmatprep.subr.mxu1 %v3440_v19 }
  0xab   :  { %1348 = vmatpush1.msra.mxu0 %v2872_v63  ;;  %1443 = vmatpush1.msra.mxu1 %v3441_v0 }
  0xac   :  { %1351 = vmatprep.subr.mxu0 %v2920_v23  ;;  %1445 = vmatprep.subr.mxu1 %v3442_v18 }
  0xad   :  { %1354 = vmatpush1.msra.mxu0 %v2907_v24  ;;  %1447 = vmatpush1.msra.mxu1 %v3443_v47  ;;  %v3445_v24 = vld [vmem:[#allocation21_spill] sm:$0xff] }
  0xae   :  { %1357 = vmatprep.subr.mxu0 %v2934_v32  ;;  %1449 = vmatprep.subr.mxu1 %v3444_v16  ;;  %v3446_v16 = vand.u32 4294901760, %v2518_v29  ;;  %v3450_v29 = vand.u32 4294901760, %v2568_v3  ;;  %v3455_v3 = vand.u32 4294901760, %v2646_v48  ;;  %v3459_v48 = vand.u32 4294901760, %v2707_v17 }
  0xaf   :  { %1360 = vmatpush1.msra.mxu0 %v2938_v33  ;;  %1451 = vmatpush1.msra.mxu1 %v2797_v60  ;;  %v3447_v60 = vand.u32 4294901760, %v2510_v31  ;;  %v3451_v31 = vand.u32 4294901760, %v2574_v42  ;;  %v3456_v42 = vand.u32 4294901760, %v2626_v62  ;;  %v3468_v17 = vand.u32 4294901760, %v2849_v57 }
  0xb0   :  { %1363 = vmatprep.subr.mxu0 %v2950_v36  ;;  %1453 = vmatprep.subr.mxu1 %v2812_v5  ;;  %v3469_v62 = vand.u32 4294901760, %v2867_v59  ;;  %v3479_v59 = vand.u32 4294901760, %v2938_v33 }
  0xb1   :  { %1366 = vmatpush1.msra.mxu0 %v2954_v28  ;;  %1399 = vmatprep.mubr.f32.mxu0 %v3327_v38  ;;  %v3448_v28 = vand.u32 4294901760, %v2553_v45  ;;  %v3452_v45 = vand.u32 4294901760, %v2620_v34  ;;  %v3457_v34 = vand.u32 4294901760, %v2661_v7 }
  0xb2   :  { %1455 = vmatpush1.msra.mxu1 %v2799_v35  ;;  %1402 = vmatmul.mubr.f32.vlgmr.msra.gmra.mxu0 %v3445_v24  ;;  %v3449_v35 = vand.u32 4294901760, %v2524_v39  ;;  %v3453_v39 = vand.u32 4294901760, %v2582_v46  ;;  %v3458_v46 = vand.u32 4294901760, %v2637_v27  ;;  %v3470_v27 = vld [vmem:[#allocation26_spill] sm:$0xff]  ;;  %v3481_v24 = vand.u32 4294901760, %v2950_v36 }
  0xb3   :  { %1457 = vmatprep.subr.mxu1 %v2838_v49  ;;  %1517 = vmatprep.subr.mxu0 %v3446_v16  ;;  %v3471_v7 = vand.u32 4294901760, %v3470_v27  ;;  %v3478_v16 = vld [vmem:[#allocation12_spill] sm:$0xff] }
  0xb4   :  { %1459 = vmatpush1.msra.mxu1 %v2827_v55  ;;  %1521 = vmatpush1.msra.mxu0 %v3447_v60  ;;  %v3454_v60 = vld [vmem:[#allocation22_spill] sm:$0xff] }
  0xb5   :  { %1461 = vmatprep.subr.mxu1 %v2874_v22  ;;  %1525 = vmatprep.subr.mxu0 %v3448_v28 }
  0xb6   :  { %1463 = vmatpush1.msra.mxu1 %v2861_v9  ;;  %1529 = vmatpush1.msra.mxu0 %v3449_v35  ;;  %v3475_v35 = vld [vmem:[#allocation27_spill] sm:$0xff] }
  0xb7   :  { %1465 = vmatprep.subr.mxu1 %v2896_v20  ;;  %1533 = vmatprep.subr.mxu0 %v3450_v29  ;;  %v3476_v57 = vand.u32 4294901760, %v3475_v35 }
  0xb8   :  { %1467 = vmatpush1.msra.mxu1 %v2909_v37  ;;  %1537 = vmatpush1.msra.mxu0 %v3451_v31 }
  0xb9   :  { %1469 = vmatprep.subr.mxu1 %v2916_v12  ;;  %1541 = vmatprep.subr.mxu0 %v3452_v45 }
  0xba   :  { %1471 = vmatpush1.msra.mxu1 %v2926_v8  ;;  %1504 = vmatprep.mubr.f32.mxu1 %v3327_v38 }
  0xbb   :  { %1545 = vmatpush1.msra.mxu0 %v3453_v39  ;;  %1508 = vmatmul.mubr.f32.vlgmr.msra.gmra.mxu1 %v3454_v60 }
  0xbc   :  { %1549 = vmatprep.subr.mxu0 %v3455_v3  ;;  %1683 = vmatprep.subr.mxu1 %v2482_v13  ;;  %v3460_v13 = vand.u32 4294901760, %v2680_v15  ;;  %v3473_v15 = vand.u32 4294901760, %v2872_v63  ;;  %v3480_v63 = vld [vmem:[#allocation24_spill] sm:$0xff] }
  0xbd   :  { %1553 = vmatpush1.msra.mxu0 %v3456_v42  ;;  %1685 = vmatpush1.msra.mxu1 %v2484_v43  ;;  %v3461_v43 = vand.u32 4294901760, %v3427_v26 }
  0xbe   :  { %1557 = vmatprep.subr.mxu0 %v3457_v34  ;;  %1687 = vmatprep.subr.mxu1 %v2512_v58  ;;  %v3462_v58 = vand.u32 4294901760, %v2733_v51  ;;  %v3466_v51 = vand.u32 4294901760, %v2771_v40  ;;  %v3474_v40 = vand.u32 4294901760, %v2920_v23  ;;  %v3482_v23 = vld [vmem:[#allocation28_spill] sm:$0xff] }
  0xbf   :  { %1561 = vmatpush1.msra.mxu0 %v3458_v46  ;;  %1689 = vmatpush1.msra.mxu1 %v2492_v44  ;;  %v3463_v44 = vand.u32 4294901760, %v2788_v21  ;;  %v3467_v21 = vand.u32 4294901760, %v2845_v1  ;;  %v3472_v1 = vand.u32 4294901760, %v2890_v61  ;;  %v3477_v61 = vand.u32 4294901760, %v2934_v32  ;;  %v3485_v32 = vld [vmem:[#allocation20_spill] sm:$0xff] }
  0xc0   :  { %1565 = vmatprep.subr.mxu0 %v3459_v48  ;;  %1691 = vmatprep.subr.mxu1 %v2526_v2  ;;  %v3464_v2 = vand.u32 4294901760, %v3431_v50 }
  0xc1   :  { %1569 = vmatpush1.msra.mxu0 %v3460_v13  ;;  %1693 = vmatpush1.msra.mxu1 %v2531_v56  ;;  %v3465_v56 = vand.u32 4294901760, %v3433_v53 }
  0xc2   :  { %1573 = vmatprep.subr.mxu0 %v3461_v43  ;;  %1695 = vmatprep.subr.mxu1 %v3428_v30 }
  0xc3   :  { %1577 = vmatpush1.msra.mxu0 %v3462_v58  ;;  %1697 = vmatpush1.msra.mxu1 %v3429_v6 }
  0xc4   :  { %1581 = vmatprep.subr.mxu0 %v3463_v44  ;;  %1699 = vmatprep.subr.mxu1 %v3430_v11 }
  0xc5   :  { %1585 = vmatpush1.msra.mxu0 %v3464_v2  ;;  %1701 = vmatpush1.msra.mxu1 %v3432_v4 }
  0xc6   :  { %1589 = vmatprep.subr.mxu0 %v3465_v56  ;;  %1703 = vmatprep.subr.mxu1 %v3434_v25  ;;  %v1816_v25 = vmov 1983009808  }
  0xc7   :  { %1593 = vmatpush1.msra.mxu0 %v3466_v51  ;;  %1705 = vmatpush1.msra.mxu1 %v3435_v10  ;;  %v1793_v10 = vunpack.c.l.s4 %v1816_v25 }
  0xc8   :  { %1597 = vmatprep.subr.mxu0 %v3467_v21  ;;  %1707 = vmatprep.subr.mxu1 %v3436_v41  ;;  %v1795_v41 = vlaneseq }
  0xc9   :  { %1601 = vmatpush1.msra.mxu0 %v3468_v17  ;;  %1709 = vmatpush1.msra.mxu1 %v3437_v52  ;;  %v1794_v34 = vunpack.c.0.s8 %v1793_v10 }
  0xca   :  { %1605 = vmatprep.subr.mxu0 %v3469_v62  ;;  %1711 = vmatprep.subr.mxu1 %v3438_v54  ;;  %v1796_v46 = vshrl.u32 %v1795_v41, 7 }
  0xcb   :  { %1609 = vmatpush1.msra.mxu0 %v3471_v7  ;;  %1713 = vmatpush1.msra.mxu1 %v3439_v14 }
  0xcc   :  { %1613 = vmatprep.subr.mxu0 %v3472_v1  ;;  %1715 = vmatprep.subr.mxu1 %v3440_v19  ;;  %v3483_v19 = vand.u32 4294901760, %v3482_v23  ;;  %v1797_v27 = vsub.s32 %v1794_v34, %v1796_v46 }
  0xcd   :  { %1617 = vmatpush1.msra.mxu0 %v3473_v15  ;;  %1717 = vmatpush1.msra.mxu1 %v3441_v0 }
  0xce   :  { %1621 = vmatprep.subr.mxu0 %v3474_v40  ;;  %1719 = vmatprep.subr.mxu1 %v3442_v18 }
  0xcf   :  { %1625 = vmatpush1.msra.mxu0 %v3476_v57  ;;  %1721 = vmatpush1.msra.mxu1 %v3443_v47  ;;  %v3484_v47 = vld [vmem:[#allocation13_spill] sm:$0xff] }
  0xd0   :  { %1629 = vmatprep.subr.mxu0 %v3477_v61  ;;  %1723 = vmatprep.subr.mxu1 %v3478_v16 }
  0xd1   :  { %1633 = vmatpush1.msra.mxu0 %v3479_v59  ;;  %1725 = vmatpush1.msra.mxu1 %v3480_v63 }
  0xd2   :  { %1637 = vmatprep.subr.mxu0 %v3481_v24  ;;  %1727 = vmatprep.subr.mxu1 %v2812_v5 }
  0xd3   :  { %1641 = vmatpush1.msra.mxu0 %v3483_v19  ;;  %1674 = vmatprep.mubr.f32.mxu0 %v3327_v38 }
  0xd4   :  { %1729 = vmatpush1.msra.mxu1 %v3484_v47  ;;  %1676 = vmatmul.mubr.f32.vlgmr.msra.gmra.mxu0 %v3485_v32 }
  0xd5   :  { %1731 = vmatprep.subr.mxu1 %v2838_v49  ;;  %1778 = vmatprep.mubr.f32.mxu1 %v3327_v38 }
  0xd6   :  { %1733 = vmatpush1.msra.mxu1 %v2827_v55 }
  0xd7   :  { %1735 = vmatprep.subr.mxu1 %v2874_v22 }
  0xd8   :  { %1737 = vmatpush1.msra.mxu1 %v2861_v9 }
  0xd9   :  { %1739 = vmatprep.subr.mxu1 %v2896_v20 }
  0xda   :  { %1741 = vmatpush1.msra.mxu1 %v2909_v37 }
  0xdb   :  { %1743 = vmatprep.subr.mxu1 %v2916_v12 }
  0xdc   :  { %1745 = vmatpush1.msra.mxu1 %v2926_v8 }
  0xdd   :  { %1780 = vmatmul.mubr.f32.vlgmr.msra.gmra.mxu1 %v3485_v32 }
  0xec   :  { %v179_v5 = vpop.f32.mrf.mxu0 }
  0xee   :  { %v181_v49 = vpop.f32.mrf.mxu0 }
  0xf3   :  { %v411_v33 = vpop.f32.mrf.mxu1 }
  0xf4   :  { %v412_v4 = vadd.f32 %v411_v33, %v179_v5 }
  0xf5   :  { %v413_v36 = vpop.f32.mrf.mxu1 }
  0xf6   :  { %v414_v8 = vadd.f32 %v413_v36, %v181_v49 }
 0x10d   :  { %v548_v38 = vpop.f32.mrf.mxu0 }
 0x10e   :  { %v549_v54 = vadd.f32 %v548_v38, %v412_v4 }
 0x10f   :  { %v550_v55 = vpop.f32.mrf.mxu0 }
 0x110   :  { %v551_v53 = vadd.f32 %v550_v55, %v414_v8 }
 0x115   :  { %v654_v28 = vpop.f32.mrf.mxu1 }
 0x116   :  { %v655_v39 = vadd.f32 %v654_v28, %v549_v54 }
 0x117   :  { %v656_v18 = vpop.f32.mrf.mxu1 }
 0x118   :  { %v657_v14 = vadd.f32 %v656_v18, %v551_v53 }
 0x12f   :  { %v822_v22 = vpop.f32.mrf.mxu0 }
 0x130   :  { %v823_v13 = vadd.f32 %v822_v22, %v655_v39 }
 0x131   :  { %v824_v9 = vpop.f32.mrf.mxu0 }
 0x132   :  { %v825_v60 = vadd.f32 %v824_v9, %v657_v14 }
 0x137   :  { %v926_v0 = vpop.f32.mrf.mxu1 }
 0x138   :  { %v927_v56 = vadd.f32 %v926_v0, %v823_v13 }
 0x139   :  { %v928_v26 = vpop.f32.mrf.mxu1 }
 0x13a   :  { %v929_v43 = vadd.f32 %v928_v26, %v825_v60 }
 0x13c   :  { %v1790_v62 = vcombine.low %v927_v56, %v929_v43 }
 0x13e   :  { %v1798_v40 = vrot.slane %v1790_v62, %v1797_v27 }
 0x151   :  { %v1034_v20 = vpop.f32.mrf.mxu0 }
 0x153   :  { %v1036_v37 = vpop.f32.mrf.mxu0 }
 0x159   :  { %v1266_v30 = vpop.f32.mrf.mxu1 }
 0x15a   :  { %v1267_v29 = vadd.f32 %v1266_v30, %v1034_v20 }
 0x15b   :  { %v1268_v6 = vpop.f32.mrf.mxu1 }
 0x15c   :  { %v1269_v31 = vadd.f32 %v1268_v6, %v1036_v37 }
 0x172   :  { %v1403_v12 = vpop.f32.mrf.mxu0 }
 0x173   :  { %v1404_v3 = vadd.f32 %v1403_v12, %v1267_v29 }
 0x174   :  { %v1405_v11 = vpop.f32.mrf.mxu0 }
 0x175   :  { %v1406_v42 = vadd.f32 %v1405_v11, %v1269_v31 }
 0x17b   :  { %v1509_v50 = vpop.f32.mrf.mxu1 }
 0x17c   :  { %v1510_v58 = vadd.f32 %v1509_v50, %v1404_v3 }
 0x17d   :  { %v1511_v45 = vpop.f32.mrf.mxu1 }
 0x17e   :  { %v1512_v44 = vadd.f32 %v1511_v45, %v1406_v42 }
 0x194   :  { %v1677_v52 = vpop.f32.mrf.mxu0 }
 0x195   :  { %v1678_v51 = vadd.f32 %v1677_v52, %v1510_v58 }
 0x196   :  { %v1679_v48 = vpop.f32.mrf.mxu0 }
 0x197   :  { %v1680_v21 = vadd.f32 %v1679_v48, %v1512_v44 }
 0x19d   :  { %v1781_v2 = vpop.f32.mrf.mxu1 }
 0x19e   :  { %v1782_v7 = vadd.f32 %v1781_v2, %v1678_v51 }
 0x19f   :  { %v1783_v17 = vpop.f32.mrf.mxu1 }
 0x1a0   :  { %v1784_v1 = vadd.f32 %v1783_v17, %v1680_v21 }
 0x1a2   :  { %v1791_v15 = vcombine.low %v1782_v7, %v1784_v1 }
 0x1a4   :  { %v1805_v35 = vrot.slane %v1791_v15, %v1797_v27 }
 0x1a6   :  { %v1806_v57 = vcombine.low %v1798_v40, %v1805_v35 }
 0x1a8   :  { %1808 = vst [vmem:[%s3169_s2] sm:$0xff] %v1806_v57 }

</bundles_post_ra>
